<compile_context>
chip_gen: v6e
topology: v6e:2x2x1
jax: 0.10.0
libtpu: 0.0.40
codegen_flags: <defaults>
</compile_context>

<pallas_src>
import functools
import math

import jax
import jax.numpy as jnp
from jax.experimental import pallas as pl
from jax.experimental.pallas import tpu as pltpu


def _gaintune_kernel(wb_ref, x_ref, o_ref):
    """One row-tile of the folded GainTune MLP.

    wb_ref: SMEM (6,) f32      -> [w_eff[0..4], b_eff]  (scalar prefetch)
    x_ref : VMEM (5, tb, 128)  -> features on the leading axis, rows packed
                                  densely onto (sublane, lane)
    o_ref : VMEM (tb, 128) f32 -> dense output slab (full vreg stores)
    """
    in_dim = x_ref.shape[0]
    acc = jnp.zeros(o_ref.shape, jnp.float32)
    # Fully unrolled 5-step broadcast-FMA chain on the VPU (no MXU, no XLU).
    for k in range(in_dim):
        acc = acc + wb_ref[k] * x_ref[k].astype(jnp.float32)
    o_ref[...] = acc + wb_ref[in_dim]


def _round_up(a, b):
    return (a + b - 1) // b * b


@functools.partial(jax.jit, static_argnames=("tile",))
def _gaintune_impl(x, w1, b1, w2, b2, *, tile):
    lead_shape = x.shape[:-1]
    in_dim = x.shape[-1]
    assert in_dim == 5
    xf = x.reshape(-1, in_dim)                                 # (N, 5)
    n = xf.shape[0]

    # --- Fold the two Linear layers (tiny, fused under jit) ---
    w_eff = (w2 @ w1).reshape(in_dim)                          # (5,)
    b_eff = (w2 @ b1 + b2).reshape(1)                          # (1,)
    wb = jnp.concatenate([w_eff, b_eff])                       # (6,) -> SMEM prefetch

    # --- Dense (sublane, lane) row packing ---
    # TODO(synk): if the caller can supply x feature-major (5, N) upstream, this
    # transpose (one fused XLA copy under jit) disappears entirely.
    n128 = _round_up(max(n, 1), 128)                           # lane granule only
    n_sub = n128 // 128
    xt = jnp.swapaxes(xf, 0, 1)                                # (5, N), caller dtype
    xt = jnp.pad(xt, ((0, 0), (0, n128 - n)))                  # fuses with transpose
    x3 = xt.reshape(in_dim, n_sub, 128)                        # free view of (5, n128)

    # Row tile: tb 128-row groups per grid step.  Granule keeps the sublane dim
    # native-tile aligned for the input dtype (8 for f32, 16 for bf16, ...).
    itemsize = jnp.dtype(x.dtype).itemsize
    sub_granule = max(8, 32 // itemsize)
    tb = max(sub_granule,
             min(_round_up(max(tile // 128, 1), sub_granule),
                 _round_up(n_sub, sub_granule)))
    grid = (pl.cdiv(n_sub, tb),)                               # partial last block OK

    out = pl.pallas_call(
        _gaintune_kernel,
        out_shape=jax.ShapeDtypeStruct((n_sub, 128), jnp.float32),
        grid_spec=pltpu.PrefetchScalarGridSpec(
            num_scalar_prefetch=1,                             # wb -> SMEM
            grid=grid,
            in_specs=[pl.BlockSpec((in_dim, tb, 128), lambda i, _wb: (0, i, 0))],
            out_specs=pl.BlockSpec((tb, 128), lambda i, _wb: (i, 0)),
        ),
        compiler_params=pltpu.CompilerParams(
            dimension_semantics=("parallel",),                 # megacore row split
        ),
        cost_estimate=pl.CostEstimate(
            flops=10 * n128,
            transcendentals=0,
            bytes_accessed=n128 * (in_dim * itemsize + 4),
        ),
    )(wb, x3)

    # NOTE: padded rows (zero input) evaluate to b_eff, and out-of-bounds rows of
    # the partial last block are unspecified — both are sliced off here; never
    # reduce over or otherwise consume the padded tail.
    return out.reshape(n128)[:n].reshape(lead_shape + (1,))


def gaintune_forward(x, params, *, tile=131072):
    """Pallas-backed forward pass matching GainTune.forward.

    x: array of shape (..., 5); cast to float32 in-register inside the kernel
       (mirrors x.float()), so bf16 inputs stay bf16 through HBM/VMEM.
    params: dict with w1 (3,5), b1 (3,), w2 (1,3), b2 (1,)  [PyTorch Linear layout].
    returns: array of shape (..., 1), float32.
    """
    return _gaintune_impl(
        jnp.asarray(x),
        jnp.asarray(params["w1"], jnp.float32),
        jnp.asarray(params["b1"], jnp.float32),
        jnp.asarray(params["w2"], jnp.float32),
        jnp.asarray(params["b2"], jnp.float32),
        tile=int(tile),
    )


def init_gaintune_params(key):
    """Deterministic init mirroring nn.Linear default (U[-1/sqrt(fan_in), +])."""
    k1, k2, k3, k4 = jax.random.split(key, 4)
    bound1 = 1.0 / math.sqrt(5.0)
    bound2 = 1.0 / math.sqrt(3.0)
    return {
        "w1": jax.random.uniform(k1, (3, 5), jnp.float32, -bound1, bound1),
        "b1": jax.random.uniform(k2, (3,), jnp.float32, -bound1, bound1),
        "w2": jax.random.uniform(k3, (1, 3), jnp.float32, -bound2, bound2),
        "b2": jax.random.uniform(k4, (1,), jnp.float32, -bound2, bound2),
    }


def _reference(x, params):
    xf = jnp.asarray(x, jnp.float32)
    return (xf @ params["w1"].T + params["b1"]) @ params["w2"].T + params["b2"]


if __name__ == "__main__":
    key = jax.random.PRNGKey(0)
    pkey, xkey1, xkey2, xkey3 = jax.random.split(key, 4)

    params = init_gaintune_params(pkey)

    # Matches the module's example usage: a = torch.tensor(np.random.rand(5, 4, 5)).
    x = jax.random.uniform(xkey1, (5, 4, 5), jnp.float32)
    y = gaintune_forward(x, params)
    jax.block_until_ready(y)
    ref = _reference(x, params)
    assert y.shape == (5, 4, 1)
    assert jnp.allclose(y, ref, atol=1e-5, rtol=1e-5)

    # Multi-step grid with a masked partial last block:
    # N = 2560 rows -> n_sub = 20; tile=1024 -> tb = 8 -> grid = cdiv(20, 8) = 3.
    x2 = jax.random.uniform(xkey2, (20, 128, 5), jnp.float32)
    y2 = gaintune_forward(x2, params, tile=1024)
    jax.block_until_ready(y2)
    ref2 = _reference(x2, params)
    assert y2.shape == (20, 128, 1)
    assert jnp.allclose(y2, ref2, atol=1e-5, rtol=1e-5)

    # bf16 input stays bf16 through HBM/VMEM; the kernel widens to f32 in-register.
    x3 = jax.random.uniform(xkey3, (3, 100, 5), jnp.float32).astype(jnp.bfloat16)
    y3 = gaintune_forward(x3, params)
    jax.block_until_ready(y3)
    ref3 = _reference(x3, params)
    assert y3.shape == (3, 100, 1)
    assert jnp.allclose(y3, ref3, atol=1e-4, rtol=1e-4)

    # TODO(synk): training path (_forward_learn with Adam/MSELoss) is out of scope
    # for a forward-pass kernel.

    print("KERNEL_OK")
</pallas_src>

<mosaic_0001>
module attributes {stable_mosaic.version = 11 : i64} {
  func.func @_gaintune_kernel(%arg0: i32, %arg1: memref<6xf32, #tpu.memory_space<smem>>, %arg2: memref<5x8x128xf32, #tpu.memory_space<vmem>>, %arg3: memref<8x128xf32, #tpu.memory_space<vmem>>) attributes {dimension_semantics = [#tpu.dimension_semantics<parallel>], iteration_bounds = array<i64: 1>, scalar_prefetch = 1 : i64, scratch_operands = 0 : i64, tpu.core_type = #tpu.core_type<tc>, window_params = [{transform_indices = @transform_0, window_bounds = array<i64: 5, 8, 128>}, {transform_indices = @transform_1, window_bounds = array<i64: 8, 128>}]} {
    %cst = arith.constant 0.000000e+00 : f32
    %0 = vector.broadcast %cst : f32 to vector<8x128xf32>
    %c0 = arith.constant 0 : index
    %1 = memref.load %arg1[%c0] : memref<6xf32, #tpu.memory_space<smem>>
    %c0_0 = arith.constant 0 : index
    %c0_1 = arith.constant 0 : index
    %c0_2 = arith.constant 0 : index
    %2 = vector.load %arg2[%c0_0, %c0_1, %c0_2] : memref<5x8x128xf32, #tpu.memory_space<vmem>>, vector<1x8x128xf32>
    %3 = vector.shape_cast %2 : vector<1x8x128xf32> to vector<8x128xf32>
    %4 = vector.broadcast %1 : f32 to vector<8x128xf32>
    %5 = arith.mulf %4, %3 : vector<8x128xf32>
    %6 = arith.addf %0, %5 : vector<8x128xf32>
    %c1 = arith.constant 1 : index
    %7 = memref.load %arg1[%c1] : memref<6xf32, #tpu.memory_space<smem>>
    %c1_3 = arith.constant 1 : index
    %c0_4 = arith.constant 0 : index
    %c0_5 = arith.constant 0 : index
    %8 = vector.load %arg2[%c1_3, %c0_4, %c0_5] : memref<5x8x128xf32, #tpu.memory_space<vmem>>, vector<1x8x128xf32>
    %9 = vector.shape_cast %8 : vector<1x8x128xf32> to vector<8x128xf32>
    %10 = vector.broadcast %7 : f32 to vector<8x128xf32>
    %11 = arith.mulf %10, %9 : vector<8x128xf32>
    %12 = arith.addf %6, %11 : vector<8x128xf32>
    %c2 = arith.constant 2 : index
    %13 = memref.load %arg1[%c2] : memref<6xf32, #tpu.memory_space<smem>>
    %c2_6 = arith.constant 2 : index
    %c0_7 = arith.constant 0 : index
    %c0_8 = arith.constant 0 : index
    %14 = vector.load %arg2[%c2_6, %c0_7, %c0_8] : memref<5x8x128xf32, #tpu.memory_space<vmem>>, vector<1x8x128xf32>
    %15 = vector.shape_cast %14 : vector<1x8x128xf32> to vector<8x128xf32>
    %16 = vector.broadcast %13 : f32 to vector<8x128xf32>
    %17 = arith.mulf %16, %15 : vector<8x128xf32>
    %18 = arith.addf %12, %17 : vector<8x128xf32>
    %c3 = arith.constant 3 : index
    %19 = memref.load %arg1[%c3] : memref<6xf32, #tpu.memory_space<smem>>
    %c3_9 = arith.constant 3 : index
    %c0_10 = arith.constant 0 : index
    %c0_11 = arith.constant 0 : index
    %20 = vector.load %arg2[%c3_9, %c0_10, %c0_11] : memref<5x8x128xf32, #tpu.memory_space<vmem>>, vector<1x8x128xf32>
    %21 = vector.shape_cast %20 : vector<1x8x128xf32> to vector<8x128xf32>
    %22 = vector.broadcast %19 : f32 to vector<8x128xf32>
    %23 = arith.mulf %22, %21 : vector<8x128xf32>
    %24 = arith.addf %18, %23 : vector<8x128xf32>
    %c4 = arith.constant 4 : index
    %25 = memref.load %arg1[%c4] : memref<6xf32, #tpu.memory_space<smem>>
    %c4_12 = arith.constant 4 : index
    %c0_13 = arith.constant 0 : index
    %c0_14 = arith.constant 0 : index
    %26 = vector.load %arg2[%c4_12, %c0_13, %c0_14] : memref<5x8x128xf32, #tpu.memory_space<vmem>>, vector<1x8x128xf32>
    %27 = vector.shape_cast %26 : vector<1x8x128xf32> to vector<8x128xf32>
    %28 = vector.broadcast %25 : f32 to vector<8x128xf32>
    %29 = arith.mulf %28, %27 : vector<8x128xf32>
    %30 = arith.addf %24, %29 : vector<8x128xf32>
    %c5 = arith.constant 5 : index
    %31 = memref.load %arg1[%c5] : memref<6xf32, #tpu.memory_space<smem>>
    %32 = vector.broadcast %31 : f32 to vector<8x128xf32>
    %33 = arith.addf %30, %32 : vector<8x128xf32>
    %c0_15 = arith.constant 0 : index
    %c0_16 = arith.constant 0 : index
    %34 = vector.load %arg3[%c0_15, %c0_16] : memref<8x128xf32, #tpu.memory_space<vmem>>, vector<8x128xf32>
    tpu.vector_store %arg3[%c0_15, %c0_16], %33 {strides = array<i32>} : memref<8x128xf32, #tpu.memory_space<vmem>>, vector<8x128xf32>,
    return
  }
  func.func @transform_0(%arg0: i32, %arg1: memref<6xf32, #tpu.memory_space<smem>>) -> (i32, i32, i32) {
    %c0_i32 = arith.constant 0 : i32
    %c0_i32_0 = arith.constant 0 : i32
    %c0_i32_1 = arith.constant 0 : i32
    return %c0_i32, %arg0, %c0_i32_0 : i32, i32, i32
  }
  func.func @transform_1(%arg0: i32, %arg1: memref<6xf32, #tpu.memory_space<smem>>) -> (i32, i32) {
    %c0_i32 = arith.constant 0 : i32
    %c0_i32_0 = arith.constant 0 : i32
    return %arg0, %c0_i32 : i32, i32
  }
}

</mosaic_0001>

<bundles_post_ra>
// kernel: _gaintune_impl.1
= control target key start
LH: loop header
LB: loop body
LE: loop exit
PB: predicated region body
PF: predicated region fallthrough
CT: control target
= control target key end

     0   :  { %s201_s0 = inlined_call_operand.vmem [shape: f32[6], index: 0, kind: input, shape index: {}]   ;;  %s202_s1 = inlined_call_operand.vmem [shape: f32[5,1,128], index: 1, kind: input, shape index: {}]   ;;  %s203_s2 = inlined_call_operand.vmem [shape: f32[1,128], index: 2, kind: output, shape index: {}]  }
   0x1   :  { %s7_s11 = sshll.u32 %s201_s0, 4  ;;  %s8_s11 = int_to_ptr.vmem [resolvable:$true] %s7_s11 }
   0x2   :  { %s150_s12 = scalar_lea.vmem %s8_s11, 16  ;;  %p155_p1 = scmp.lt.s32.totalorder %s8_s11, %s8_s11 }
   0x3   :  { %p151_p0 = scmp.ne.s32.totalorder %s8_s11, %s150_s12  ;;  %p156_p2 = scmp.lt.s32.totalorder %s150_s12, %s150_s12 }
   0x5   :  { %p157_p3 = por %p156_p2, %p155_p1 }
   0x7   :  { %p158_p4 = pnand %p157_p3, %p151_p0 }
   0x9   :  { %161 = shalt.err (!%p158_p4)  }
   0xa   :  { %s164_s13 = smov [#allocation3]  }
   0xb   :  { %10 = dma.vmem_to_smem %s8_s11, 16, %s164_s13, [#allocation2] }
   0xc   :  { %162 = dma.done.wait [#allocation2], 16 }
   0xd   :  { %163 = vsyncadd [#allocation2], 4294967280 }
   0xe   :  { %12 = sfence }
   0xf   :  { %v31_v0 = vld [vmem:[%s202_s1] sm:$0x1]  ;;  %v33_v1 = vld [vmem:[%s202_s1 + $0x1] sm:$0x1]  ;;  %v35_v2 = vld [vmem:[%s202_s1 + $0x2] sm:$0x1] }
  0x10   :  { %32 = vst [vmem:[#allocation4 + $0x8] sm:$0x1] %v31_v0  ;;  %34 = vst [vmem:[#allocation4] sm:$0x1] %v33_v1  ;;  %v37_v3 = vld [vmem:[%s202_s1 + $0x3] sm:$0x1] }
  0x11   :  { %36 = vst [vmem:[#allocation4 + $0x20] sm:$0x1] %v35_v2  ;;  %v39_v4 = vld [vmem:[%s202_s1 + $0x4] sm:$0x1]  ;;  %s66_s23 = sld [smem:[#allocation3]] }
  0x12   :  { %38 = vst [vmem:[#allocation4 + $0x10] sm:$0x1] %v37_v3  ;;  %40 = vst [vmem:[#allocation4 + $0x18] sm:$0x1] %v39_v4  ;;  %s144_s24 = sld [smem:[#allocation3 + $0x1]] }
  0x13   :  { %s145_s25 = sld [smem:[#allocation3 + $0x2]] }
  0x14   :  { %s146_s26 = sld [smem:[#allocation3 + $0x3]] }
  0x15   :  { %s147_s27 = sld [smem:[#allocation3 + $0x4]] }
  0x16   :  { %s148_s28 = sld [smem:[#allocation3 + $0x5]] }
  0x17   :  { %v68_v5 = vstv %s66_s23  ;;  %v67_v6 = vld [vmem:[#allocation4 + $0x8] sm:$0xff]  ;;  %v73_v7 = vld [vmem:[#allocation4] sm:$0xff] }
  0x18   :  { %v74_v8 = vstv %s144_s24  ;;  %v79_v9 = vld [vmem:[#allocation4 + $0x20] sm:$0xff]  ;;  %v69_v10 = vmul.f32 %v68_v5, %v67_v6 }
  0x19   :  { %v75_v11 = vmul.f32 %v74_v8, %v73_v7  ;;  %v80_v12 = vstv %s145_s25  ;;  %v85_v13 = vld [vmem:[#allocation4 + $0x10] sm:$0xff]  ;;  %v91_v16 = vld [vmem:[#allocation4 + $0x18] sm:$0xff] }
  0x1a   :  { %v81_v14 = vmul.f32 %v80_v12, %v79_v9  ;;  %v86_v15 = vstv %s146_s26 }
  0x1b   :  { %v76_v17 = vadd.f32 %v75_v11, %v69_v10  ;;  %v87_v18 = vmul.f32 %v86_v15, %v85_v13  ;;  %v92_v19 = vstv %s147_s27 }
  0x1c   :  { %v93_v21 = vmul.f32 %v92_v19, %v91_v16  ;;  %v96_v23 = vstv %s148_s28 }
  0x1d   :  { %v82_v20 = vadd.f32 %v81_v14, %v76_v17 }
  0x1f   :  { %v88_v22 = vadd.f32 %v87_v18, %v82_v20 }
  0x21   :  { %v94_v24 = vadd.f32 %v93_v21, %v88_v22 }
  0x23   :  { %v97_v25 = vadd.f32 %v96_v23, %v94_v24 }
  0x25   :  { %98 = vst [vmem:[#allocation5] sm:$0xff] %v97_v25 }
  0x2c   :  { %v117_v26 = vld [vmem:[#allocation5] sm:$0x1] }
  0x2d   :  { %118 = vst [vmem:[%s203_s2] sm:$0x1] %v117_v26 }

</bundles_post_ra>
